<compile_context>
chip_gen: v7x
topology: tpu7x:2x2x1
jax: 0.10.0
libtpu: 0.0.40
codegen_flags: <defaults>
</compile_context>

<pallas_src>
import functools

import jax
import jax.numpy as jnp
from jax.experimental import pallas as pl
from jax.experimental.pallas import tpu as pltpu

LANE = 128        # lane width / MXU alignment for feature axes
PAD_N = 256       # node-count padding granularity (multiple of 8 and 128)
MAX_TM = 1024     # cap on aggregation row tile
MAX_TK = 2048     # cap on aggregation contraction tile


def _round_up(x, m):
    return (x + m - 1) // m * m


def _pad2(a, rows, cols):
    return jnp.pad(a, ((0, rows - a.shape[0]), (0, cols - a.shape[1])))


def _pick_tile(n_pad, cap, step=PAD_N):
    """Largest multiple of `step` that divides n_pad and is <= cap."""
    best = step
    t = step
    lim = min(cap, n_pad)
    while t <= lim:
        if n_pad % t == 0:
            best = t
        t += step
    return best


# ---------------------------------------------------------------------------
# Kernel 1: scaled feature transform  H = (X @ W) * d^{-1/2}_src  (bf16 out)
# ---------------------------------------------------------------------------
def _xw_kernel(x_ref, w_ref, s_ref, h_ref):
    h = jnp.dot(x_ref[...], w_ref[...], preferred_element_type=jnp.float32)
    h_ref[...] = (h * s_ref[...]).astype(h_ref.dtype)


def feature_transform(x_bf16, w_bf16, dsqrt, *, tm):
    n_pad, f_in = x_bf16.shape
    f_out = w_bf16.shape[1]
    return pl.pallas_call(
        _xw_kernel,
        out_shape=jax.ShapeDtypeStruct((n_pad, f_out), jnp.bfloat16),
        grid=(n_pad // tm,),
        in_specs=[
            pl.BlockSpec((tm, f_in), lambda i: (i, 0)),      # X row tile
            pl.BlockSpec((f_in, f_out), lambda i: (0, 0)),   # W (resident)
            pl.BlockSpec((tm, 1), lambda i: (i, 0)),         # source d^{-1/2}
        ],
        out_specs=pl.BlockSpec((tm, f_out), lambda i: (i, 0)),
        compiler_params=pltpu.CompilerParams(
            dimension_semantics=("parallel",),
            vmem_limit_bytes=32 * 1024 * 1024,
        ),
    )(x_bf16, w_bf16, dsqrt)


# ---------------------------------------------------------------------------
# Kernel 2: aggregation  OUT = d^{-1/2}_dst * ((A+I) @ H_scaled) + b  (+ReLU)
#   grid = (row tiles [parallel], contraction tiles [arbitrary, last])
#   int8 adjacency tile cast to bf16 on the VPU (hidden under the DMA: the
#   loop is HBM-bound on the adjacency bytes), f32 VMEM accumulator,
#   scale/bias/activation epilogue only on the last k step.
# ---------------------------------------------------------------------------
def _agg_kernel(adj_ref, h_ref, dsq_ref, b_ref, out_ref, acc_ref, *, apply_act):
    k = pl.program_id(1)

    @pl.when(k == 0)
    def _():
        acc_ref[...] = jnp.zeros_like(acc_ref)

    acc_ref[...] += jnp.dot(
        adj_ref[...].astype(jnp.bfloat16), h_ref[...],
        preferred_element_type=jnp.float32,
    )

    @pl.when(k == pl.num_programs(1) - 1)
    def _():
        out = acc_ref[...] * dsq_ref[...] + b_ref[...]
        if apply_act:  # activation = relu (config['activation'])
            out = jnp.maximum(out, 0.0)
        out_ref[...] = out.astype(out_ref.dtype)


def aggregate(adj_i8, h_bf16, dsqrt, b_f32, *, apply_act, out_dtype, tm, tk):
    n_pad = adj_i8.shape[0]
    f_out = h_bf16.shape[1]
    kernel = functools.partial(_agg_kernel, apply_act=apply_act)
    # TODO(synk): for very large sparse graphs, skip all-zero adjacency tiles
    # via a scalar-prefetched per-block nonzero map instead of dense N_pad^2.
    return pl.pallas_call(
        kernel,
        out_shape=jax.ShapeDtypeStruct((n_pad, f_out), out_dtype),
        grid=(n_pad // tm, n_pad // tk),                     # reduction last
        in_specs=[
            pl.BlockSpec((tm, tk), lambda i, k: (i, k)),     # (A+I) int8 tile
            pl.BlockSpec((tk, f_out), lambda i, k: (k, 0)),  # pre-scaled H tile
            pl.BlockSpec((tm, 1), lambda i, k: (i, 0)),      # dest d^{-1/2}
            pl.BlockSpec((1, f_out), lambda i, k: (0, 0)),   # bias (resident)
        ],
        out_specs=pl.BlockSpec((tm, f_out), lambda i, k: (i, 0)),
        scratch_shapes=[pltpu.VMEM((tm, f_out), jnp.float32)],
        compiler_params=pltpu.CompilerParams(
            dimension_semantics=("parallel", "arbitrary"),
            vmem_limit_bytes=48 * 1024 * 1024,
        ),
    )(adj_i8, h_bf16, dsqrt, b_f32.reshape(1, f_out))


# ---------------------------------------------------------------------------
# Glue (plain JAX): (A + I) int8 count pattern + d^{-1/2} scales, padded once
# ---------------------------------------------------------------------------
def build_adj_and_scales(edge_index, num_nodes, n_pad):
    loop = jnp.arange(num_nodes, dtype=edge_index.dtype)
    src = jnp.concatenate([edge_index[0], loop])
    dst = jnp.concatenate([edge_index[1], loop])
    # Single padded build: int32 scatter (robust on TPU) -> int8 cast.
    adj = (
        jnp.zeros((n_pad, n_pad), jnp.int32).at[dst, src].add(1).astype(jnp.int8)
    )
    # Degrees straight from the indices (no N^2 reduction pass).
    deg = jnp.zeros((n_pad,), jnp.float32).at[dst].add(1.0)
    d_inv_sqrt = jnp.where(deg > 0.0, jax.lax.rsqrt(deg), 0.0)
    return adj, d_inv_sqrt.reshape(n_pad, 1)


# ---------------------------------------------------------------------------
# GCN module (2 GCNConv layers, relu between, dropout = identity in eval)
# ---------------------------------------------------------------------------
def init_params(key, num_features, hidden_channels, num_classes):
    k1, k2 = jax.random.split(key)

    def glorot(k, fan_in, fan_out):
        limit = jnp.sqrt(6.0 / (fan_in + fan_out))
        return jax.random.uniform(
            k, (fan_in, fan_out), jnp.float32, -limit, limit
        )

    return {
        "w0": glorot(k1, num_features, hidden_channels),
        "b0": jnp.zeros((hidden_channels,), jnp.float32),
        "w1": glorot(k2, hidden_channels, num_classes),
        "b1": jnp.zeros((num_classes,), jnp.float32),
    }


def gcn_forward(params, x, edge_index, num_layers=2):
    n, f_in = x.shape
    hidden = params["w0"].shape[1]
    n_classes = params["w1"].shape[1]

    n_pad = _round_up(n, PAD_N)
    # v7x has 2 TensorCores: keep >= ~4 row tiles when the graph is big enough,
    # otherwise prefer fewer/bigger steps (per-grid-step overhead dominates).
    tm = _pick_tile(n_pad, MAX_TM if n_pad >= 4 * MAX_TM else 512)
    tk = _pick_tile(n_pad, MAX_TK)

    f_in_p = _round_up(f_in, LANE)
    hid_p = _round_up(hidden, LANE)
    cls_p = _round_up(n_classes, LANE)

    adj, dsqrt = build_adj_and_scales(edge_index, n, n_pad)

    x_p = _pad2(x, n_pad, f_in_p).astype(jnp.bfloat16)
    w0 = _pad2(params["w0"], f_in_p, hid_p).astype(jnp.bfloat16)
    b0 = jnp.pad(params["b0"], (0, hid_p - hidden))
    w1 = _pad2(params["w1"], hid_p, cls_p).astype(jnp.bfloat16)
    b1 = jnp.pad(params["b1"], (0, cls_p - n_classes))

    # NOTE: the reference PyTorch module only constructs two GCNConv layers,
    # so (exactly like the spec) num_layers must be 2 for distinct weights.
    h = x_p
    for _ in range(num_layers - 1):  # conv -> relu -> dropout(identity, eval)
        ht = feature_transform(h, w0, dsqrt, tm=tm)
        h = aggregate(adj, ht, dsqrt, b0, apply_act=True,
                      out_dtype=jnp.bfloat16, tm=tm, tk=tk)
    ht = feature_transform(h, w1, dsqrt, tm=tm)            # final conv only
    out = aggregate(adj, ht, dsqrt, b1, apply_act=False,
                    out_dtype=jnp.float32, tm=tm, tk=tk)
    return out[:n, :n_classes]


# ---------------------------------------------------------------------------
# Reference (plain JAX), mirroring the kernel's dtypes / scale folding
# ---------------------------------------------------------------------------
def _reference_forward(params, x, edge_index, num_layers=2):
    n = x.shape[0]
    loop = jnp.arange(n, dtype=edge_index.dtype)
    src = jnp.concatenate([edge_index[0], loop])
    dst = jnp.concatenate([edge_index[1], loop])
    a = jnp.zeros((n, n), jnp.float32).at[dst, src].add(1.0).astype(jnp.bfloat16)
    deg = jnp.zeros((n,), jnp.float32).at[dst].add(1.0)
    dinv = jnp.where(deg > 0.0, jax.lax.rsqrt(deg), 0.0)[:, None]

    def layer(xv, w, b, act):
        h = jnp.dot(
            xv.astype(jnp.bfloat16), w.astype(jnp.bfloat16),
            preferred_element_type=jnp.float32,
        )
        h = (h * dinv).astype(jnp.bfloat16)
        out = dinv * jnp.dot(a, h, preferred_element_type=jnp.float32) + b
        return jnp.maximum(out, 0.0) if act else out

    h = x
    for _ in range(num_layers - 1):
        h = layer(h, params["w0"], params["b0"], True)
    return layer(h, params["w1"], params["b1"], False)


if __name__ == "__main__":
    # config = {'num_layers': 2, 'dropout': 0.5, 'activation': 'relu'}
    num_nodes = 16
    num_features = 8
    hidden_channels = 16
    num_classes = 4
    num_edges = 40

    key = jax.random.PRNGKey(0)
    k_x, k_e, k_p = jax.random.split(key, 3)

    x = jax.random.normal(k_x, (num_nodes, num_features), jnp.float32)
    edge_index = jax.random.randint(
        k_e, (2, num_edges), 0, num_nodes, dtype=jnp.int32
    )
    params = init_params(k_p, num_features, hidden_channels, num_classes)

    out = gcn_forward(params, x, edge_index, num_layers=2)
    out = jax.block_until_ready(out)

    ref = _reference_forward(params, x, edge_index, num_layers=2)
    assert out.shape == (num_nodes, num_classes)
    assert jnp.allclose(out, ref, atol=1e-2, rtol=1e-2), (
        float(jnp.max(jnp.abs(out - ref)))
    )

    print("KERNEL_OK")
</pallas_src>

<mosaic_0001>
module attributes {stable_mosaic.version = 11 : i64} {
  func.func @_xw_kernel(%arg0: i32, %arg1: memref<256x128xbf16, #tpu.memory_space<vmem>>, %arg2: memref<128x128xbf16, #tpu.memory_space<vmem>>, %arg3: memref<256x1xf32, #tpu.memory_space<vmem>>, %arg4: memref<256x128xbf16, #tpu.memory_space<vmem>>) attributes {dimension_semantics = [#tpu.dimension_semantics<parallel>], iteration_bounds = array<i64: 1>, scalar_prefetch = 0 : i64, scratch_operands = 0 : i64, tpu.core_type = #tpu.core_type<tc>, window_params = [{transform_indices = @transform_0, window_bounds = array<i64: 256, 128>}, {pipeline_mode = #tpu.pipeline_mode<synchronous>, transform_indices = @transform_1, window_bounds = array<i64: 128, 128>}, {transform_indices = @transform_2, window_bounds = array<i64: 256, 1>}, {transform_indices = @transform_3, window_bounds = array<i64: 256, 128>}]} {
    %c0 = arith.constant 0 : index
    %c0_0 = arith.constant 0 : index
    %0 = vector.load %arg1[%c0, %c0_0] : memref<256x128xbf16, #tpu.memory_space<vmem>>, vector<256x128xbf16>
    %c0_1 = arith.constant 0 : index
    %c0_2 = arith.constant 0 : index
    %1 = vector.load %arg2[%c0_1, %c0_2] : memref<128x128xbf16, #tpu.memory_space<vmem>>, vector<128x128xbf16>
    %cst = arith.constant dense<0.000000e+00> : vector<256x128xf32>
    %2 = tpu.matmul %0, %1, %cst {dimension_numbers = #tpu.dot_dimension_numbers<[1], [0], [0], [1], [0, 0, 1, 1], [], []>} : vector<256x128xbf16>, vector<128x128xbf16>, vector<256x128xf32> -> vector<256x128xf32>
    %c0_3 = arith.constant 0 : index
    %c0_4 = arith.constant 0 : index
    %3 = vector.load %arg3[%c0_3, %c0_4] : memref<256x1xf32, #tpu.memory_space<vmem>>, vector<256x1xf32>
    %4 = vector.broadcast %3 : vector<256x1xf32> to vector<256x128xf32>
    %5 = arith.mulf %2, %4 : vector<256x128xf32>
    %6 = arith.truncf %5 : vector<256x128xf32> to vector<256x128xbf16>
    %c0_5 = arith.constant 0 : index
    %c0_6 = arith.constant 0 : index
    %7 = vector.load %arg4[%c0_5, %c0_6] : memref<256x128xbf16, #tpu.memory_space<vmem>>, vector<256x128xbf16>
    tpu.vector_store %arg4[%c0_5, %c0_6], %6 {strides = array<i32>} : memref<256x128xbf16, #tpu.memory_space<vmem>>, vector<256x128xbf16>,
    return
  }
  func.func @transform_0(%arg0: i32) -> (i32, i32) {
    %c0_i32 = arith.constant 0 : i32
    %c0_i32_0 = arith.constant 0 : i32
    return %arg0, %c0_i32 : i32, i32
  }
  func.func @transform_1(%arg0: i32) -> (i32, i32) {
    %c0_i32 = arith.constant 0 : i32
    %c0_i32_0 = arith.constant 0 : i32
    %c0_i32_1 = arith.constant 0 : i32
    return %c0_i32, %c0_i32_0 : i32, i32
  }
  func.func @transform_2(%arg0: i32) -> (i32, i32) {
    %c0_i32 = arith.constant 0 : i32
    %c0_i32_0 = arith.constant 0 : i32
    return %arg0, %c0_i32 : i32, i32
  }
  func.func @transform_3(%arg0: i32) -> (i32, i32) {
    %c0_i32 = arith.constant 0 : i32
    %c0_i32_0 = arith.constant 0 : i32
    return %arg0, %c0_i32 : i32, i32
  }
}

</mosaic_0001>

<bundles_post_ra>
// kernel: tpu_custom_call.1
= control target key start
LH: loop header
LB: loop body
LE: loop exit
PB: predicated region body
PF: predicated region fallthrough
CT: control target
= control target key end

     0   :  { %v1094_v2 = vmov 0   ;;  %s1328_s0 = inlined_call_operand.vmem [shape: bf16[256,128], index: 0, kind: input, shape index: {}]   ;;  %s1329_s1 = inlined_call_operand.vmem [shape: bf16[128,128], index: 1, kind: input, shape index: {}]   ;;  %s1330_s2 = inlined_call_operand.vmem [shape: f32[256,1], index: 2, kind: input, shape index: {}]   ;;  %s1331_s3 = inlined_call_operand.hbm [shape: bf16[256,128], index: 3, kind: output, shape index: {}]  }
   0x1   :  { %v1046_v0 = vld [vmem:[%s1329_s1] sm:$0xff]   ;;  %v1047_v1 = vld [vmem:[%s1329_s1 + $0x8] sm:$0xff]   ;;  %1045 = vset.pattern.permute.xlu1 %v1094_v2  ;;  %1044 = vset.pattern.permute.xlu0 %v1094_v2  ;;  %v1048_v3 = vld [vmem:[%s1329_s1 + $0x10] sm:$0xff]  }
   0x2   :  { %976 = vmatprep.subr.bf16.mxu0 %v1046_v0  ;;  %1024 = vmatprep.subr.bf16.mxu1 %v1046_v0  ;;  %v371_v4 = vld [vmem:[%s1330_s2 + $0x10] sm:$0xff]  ;;  %v369_v5 = vld [vmem:[%s1330_s2] sm:$0xff]  ;;  %v1049_v6 = vld [vmem:[%s1329_s1 + $0x18] sm:$0xff]  }
   0x3   :  { %977 = vmatpush3.bf16.msra.mxu0 %v1046_v0  ;;  %1032 = vmatpush3.bf16.msra.mxu1 %v1046_v0  ;;  %v372_v7 = vld [vmem:[%s1330_s2 + $0x18] sm:$0xff]  ;;  %v370_v8 = vld [vmem:[%s1330_s2 + $0x8] sm:$0xff]  ;;  %v1054_v9 = vld [vmem:[%s1328_s0] sm:$0xff]  }
   0x4   :  { %978 = vmatprep.subr.bf16.mxu0 %v1047_v1  ;;  %1025 = vmatprep.subr.bf16.mxu1 %v1047_v1  ;;  %v1055_v10 = vld [vmem:[%s1328_s0 + $0x40] sm:$0xff]   ;;  %v374_v12 = vld [vmem:[%s1330_s2 + $0x28] sm:$0xff]  ;;  %v376_v15 = vld [vmem:[%s1330_s2 + $0x38] sm:$0xff] }
   0x5   :  { %413 = vperm.xlu1 %1045, %v371_v4   ;;  %403 = vperm.xlu0 %1044, %v369_v5   ;;  %v1050_v11 = vld [vmem:[%s1329_s1 + $0x20] sm:$0xff]   ;;  %v1051_v14 = vld [vmem:[%s1329_s1 + $0x28] sm:$0xff]   ;;  %v375_v16 = vld [vmem:[%s1330_s2 + $0x30] sm:$0xff] }
   0x6   :  { %v373_v13 = vld [vmem:[%s1330_s2 + $0x20] sm:$0xff]  ;;  %992 = vmatprep.mubr.bf16.mxu0 %v1054_v9  ;;  %1008 = vmatprep.mubr.bf16.mxu1 %v1055_v10  ;;  %v1052_v17 = vld [vmem:[%s1329_s1 + $0x30] sm:$0xff]   ;;  %v378_v18 = vld [vmem:[%s1330_s2 + $0x48] sm:$0xff] }
   0x7   :  { %979 = vmatpush3.bf16.msra.mxu0 %v1047_v1  ;;  %1033 = vmatpush3.bf16.msra.mxu1 %v1047_v1  ;;  %v377_v19 = vld [vmem:[%s1330_s2 + $0x40] sm:$0xff]  ;;  %v1053_v20 = vld [vmem:[%s1329_s1 + $0x38] sm:$0xff]   ;;  %v379_v22 = vld [vmem:[%s1330_s2 + $0x50] sm:$0xff] }
   0x8   :  { %980 = vmatprep.subr.bf16.mxu0 %v1048_v3  ;;  %1026 = vmatprep.subr.bf16.mxu1 %v1048_v3  ;;  %v380_v21 = vld [vmem:[%s1330_s2 + $0x58] sm:$0xff]  ;;  %v1056_v23 = vld [vmem:[%s1328_s0 + $0x8] sm:$0xff]   ;;  %v381_v26 = vld [vmem:[%s1330_s2 + $0x60] sm:$0xff] }
   0x9   :  { %418 = vperm.xlu1 %1045, %v372_v7   ;;  %408 = vperm.xlu0 %1044, %v370_v8   ;;  %v1057_v24 = vld [vmem:[%s1328_s0 + $0x48] sm:$0xff]   ;;  %v1058_v27 = vld [vmem:[%s1328_s0 + $0x10] sm:$0xff]   ;;  %v384_v29 = vld [vmem:[%s1330_s2 + $0x78] sm:$0xff] }
   0xa   :  { %v382_v25 = vld [vmem:[%s1330_s2 + $0x68] sm:$0xff]  ;;  %v1059_v28 = vld [vmem:[%s1328_s0 + $0x50] sm:$0xff]  }
   0xb   :  { %981 = vmatpush3.bf16.msra.mxu0 %v1048_v3  ;;  %1034 = vmatpush3.bf16.msra.mxu1 %v1048_v3  ;;  %v383_v30 = vld [vmem:[%s1330_s2 + $0x70] sm:$0xff] }
   0xc   :  { %982 = vmatprep.subr.bf16.mxu0 %v1049_v6  ;;  %1027 = vmatprep.subr.bf16.mxu1 %v1049_v6 }
   0xd   :  { %428 = vperm.xlu1 %1045, %v374_v12   ;;  %423 = vperm.xlu0 %1044, %v373_v13  }
   0xf   :  { %983 = vmatpush3.bf16.msra.mxu0 %v1049_v6  ;;  %1035 = vmatpush3.bf16.msra.mxu1 %v1049_v6 }
  0x10   :  { %984 = vmatprep.subr.bf16.mxu0 %v1050_v11  ;;  %1028 = vmatprep.subr.bf16.mxu1 %v1050_v11 }
  0x11   :  { %438 = vperm.xlu1 %1045, %v376_v15   ;;  %433 = vperm.xlu0 %1044, %v375_v16  }
  0x13   :  { %985 = vmatpush3.bf16.msra.mxu0 %v1050_v11  ;;  %1036 = vmatpush3.bf16.msra.mxu1 %v1050_v11 }
  0x14   :  { %986 = vmatprep.subr.bf16.mxu0 %v1051_v14  ;;  %1029 = vmatprep.subr.bf16.mxu1 %v1051_v14 }
  0x15   :  { %448 = vperm.xlu1 %1045, %v378_v18   ;;  %443 = vperm.xlu0 %1044, %v377_v19  }
  0x17   :  { %987 = vmatpush3.bf16.msra.mxu0 %v1051_v14  ;;  %1037 = vmatpush3.bf16.msra.mxu1 %v1051_v14 }
  0x18   :  { %988 = vmatprep.subr.bf16.mxu0 %v1052_v17  ;;  %1030 = vmatprep.subr.bf16.mxu1 %v1052_v17 }
  0x19   :  { %458 = vperm.xlu1 %1045, %v380_v21   ;;  %453 = vperm.xlu0 %1044, %v379_v22  }
  0x1b   :  { %989 = vmatpush3.bf16.msra.mxu0 %v1052_v17  ;;  %1038 = vmatpush3.bf16.msra.mxu1 %v1052_v17 }
  0x1c   :  { %990 = vmatprep.subr.bf16.mxu0 %v1053_v20  ;;  %1031 = vmatprep.subr.bf16.mxu1 %v1053_v20 }
  0x1d   :  { %468 = vperm.xlu1 %1045, %v382_v25   ;;  %463 = vperm.xlu0 %1044, %v381_v26  }
  0x1f   :  { %991 = vmatpush3.bf16.msra.mxu0 %v1053_v20  ;;  %1039 = vmatpush3.bf16.msra.mxu1 %v1053_v20 }
  0x22   :  { %993 = vmatmul.mubr.bf16.vlgmr.msra.gmra.mrb[0].mxu0 %v1056_v23  ;;  %1009 = vmatmul.mubr.bf16.vlgmr.msra.gmra.mrb[0].mxu1 %v1057_v24 }
  0x23   :  { %8 = vsyncpa [#allocation3], 0  ;;  %996 = vmatprep.mubr.bf16.mxu0 %v1058_v27  ;;  %1012 = vmatprep.mubr.bf16.mxu1 %v1059_v28  ;;  %v1060_v31 = vld [vmem:[%s1328_s0 + $0x18] sm:$0xff]   ;;  %v386_v33 = vld [vmem:[%s1330_s2 + $0x88] sm:$0xff] }
  0x24   :  { %478 = vperm.xlu1 %1045, %v384_v29   ;;  %473 = vperm.xlu0 %1044, %v383_v30   ;;  %v1061_v32 = vld [vmem:[%s1328_s0 + $0x58] sm:$0xff]   ;;  %v385_v34 = vld [vmem:[%s1330_s2 + $0x80] sm:$0xff]  ;;  %v387_v38 = vld [vmem:[%s1330_s2 + $0x90] sm:$0xff] }
  0x25   :  { %v1062_v35 = vld [vmem:[%s1328_s0 + $0x20] sm:$0xff]   ;;  %v388_v37 = vld [vmem:[%s1330_s2 + $0x98] sm:$0xff]  ;;  %v1064_v39 = vld [vmem:[%s1328_s0 + $0x28] sm:$0xff]  }
  0x26   :  { %v1063_v36 = vld [vmem:[%s1328_s0 + $0x60] sm:$0xff]   ;;  %v1065_v40 = vld [vmem:[%s1328_s0 + $0x68] sm:$0xff]   ;;  %v1066_v43 = vld [vmem:[%s1328_s0 + $0x30] sm:$0xff]  }
  0x27   :  { %v390_v41 = vld [vmem:[%s1330_s2 + $0xa8] sm:$0xff]  ;;  %v389_v42 = vld [vmem:[%s1330_s2 + $0xa0] sm:$0xff]  ;;  %v1067_v44 = vld [vmem:[%s1328_s0 + $0x70] sm:$0xff]  }
  0x28   :  { %488 = vperm.xlu1 %1045, %v386_v33   ;;  %483 = vperm.xlu0 %1044, %v385_v34   ;;  %v392_v45 = vld [vmem:[%s1330_s2 + $0xb8] sm:$0xff]  ;;  %v391_v46 = vld [vmem:[%s1330_s2 + $0xb0] sm:$0xff]  ;;  %v394_v49 = vld [vmem:[%s1330_s2 + $0xc8] sm:$0xff] }
  0x29   :  { %v1068_v47 = vld [vmem:[%s1328_s0 + $0x38] sm:$0xff]   ;;  %v393_v50 = vld [vmem:[%s1330_s2 + $0xc0] sm:$0xff]  ;;  %v395_v52 = vld [vmem:[%s1330_s2 + $0xd0] sm:$0xff] }
  0x2a   :  { %997 = vmatmul.mubr.bf16.gmra.mrb[4].mxu0 %v1060_v31  ;;  %1013 = vmatmul.mubr.bf16.gmra.mrb[4].mxu1 %v1061_v32  ;;  %v1069_v48 = vld [vmem:[%s1328_s0 + $0x78] sm:$0xff]   ;;  %v398_v53 = vld [vmem:[%s1330_s2 + $0xe8] sm:$0xff]  ;;  %v397_v54 = vld [vmem:[%s1330_s2 + $0xe0] sm:$0xff] }
  0x2b   :  { %1000 = vmatprep.mubr.bf16.mxu0 %v1062_v35  ;;  %1016 = vmatprep.mubr.bf16.mxu1 %v1063_v36  ;;  %v396_v51 = vld [vmem:[%s1330_s2 + $0xd8] sm:$0xff]  ;;  %v399_v56 = vld [vmem:[%s1330_s2 + $0xf0] sm:$0xff] }
  0x2c   :  { %498 = vperm.xlu1 %1045, %v388_v37   ;;  %493 = vperm.xlu0 %1044, %v387_v38   ;;  %v400_v55 = vld [vmem:[%s1330_s2 + $0xf8] sm:$0xff]  ;;  %s1095_s2 = smov [#allocation2]  }
  0x2d   :  { %s758_s12 = sshll.u32 %s1095_s2, 4  ;;  %s759_s12 = int_to_ptr.vmem [resolvable:$true] %s758_s12 }
  0x2e   :  { %s1070_s13 = scalar_lea.vmem %s759_s12, 2048  ;;  %p1075_p1 = scmp.lt.s32.totalorder %s759_s12, %s759_s12 }
  0x2f   :  { %p1071_p0 = scmp.ne.s32.totalorder %s759_s12, %s1070_s13  ;;  %p1076_p2 = scmp.lt.s32.totalorder %s1070_s13, %s1070_s13 }
  0x30   :  { %508 = vperm.xlu1 %1045, %v390_v41   ;;  %503 = vperm.xlu0 %1044, %v389_v42  }
  0x31   :  { %p1077_p3 = por %p1076_p2, %p1075_p1 }
  0x32   :  { %1001 = vmatmul.mubr.bf16.gmra.mrb[8].mxu0 %v1064_v39  ;;  %1017 = vmatmul.mubr.bf16.gmra.mrb[8].mxu1 %v1065_v40 }
  0x33   :  { %1004 = vmatprep.mubr.bf16.mxu0 %v1066_v43  ;;  %1020 = vmatprep.mubr.bf16.mxu1 %v1067_v44  ;;  %p1078_p4 = pnand %p1077_p3, %p1071_p0 }
  0x34   :  { %518 = vperm.xlu1 %1045, %v392_v45   ;;  %513 = vperm.xlu0 %1044, %v391_v46  }
  0x38   :  { %528 = vperm.xlu1 %1045, %v394_v49   ;;  %523 = vperm.xlu0 %1044, %v393_v50  }
  0x3a   :  { %1005 = vmatmul.mubr.bf16.gmra.mrb[12].mxu0 %v1068_v47  ;;  %1021 = vmatmul.mubr.bf16.gmra.mrb[12].mxu1 %v1069_v48 }
  0x3c   :  { %538 = vperm.xlu1 %1045, %v396_v51   ;;  %533 = vperm.xlu0 %1044, %v395_v52  }
  0x40   :  { %548 = vperm.xlu1 %1045, %v398_v53   ;;  %543 = vperm.xlu0 %1044, %v397_v54  }
  0x44   :  { %558 = vperm.xlu1 %1045, %v400_v55   ;;  %553 = vperm.xlu0 %1044, %v399_v56  }
  0x84   :  { %v414_v57 = vpop.permute.xlu1 %413  ;;  %v404_v58 = vpop.permute.xlu0 %403 }
  0x88   :  { %v419_v59 = vpop.permute.xlu1 %418  ;;  %v409_v60 = vpop.permute.xlu0 %408 }
  0x8c   :  { %v429_v61 = vpop.permute.xlu1 %428  ;;  %v424_v62 = vpop.permute.xlu0 %423 }
  0x90   :  { %v439_v63 = vpop.permute.xlu1 %438  ;;  %v434_v0 = vpop.permute.xlu0 %433 }
  0x94   :  { %v1286_v1 = vpop.permute.xlu1 %448  ;;  %v1288_v2 = vpop.permute.xlu0 %443 }
  0x98   :  { %v1290_v3 = vpop.permute.xlu1 %458  ;;  %v1292_v4 = vpop.permute.xlu0 %453 }
  0x9c   :  { %v1294_v5 = vpop.permute.xlu1 %468  ;;  %v1296_v6 = vpop.permute.xlu0 %463 }
  0xa3   :  { %v1298_v7 = vpop.permute.xlu1 %478  ;;  %v1300_v8 = vpop.permute.xlu0 %473 }
  0xa7   :  { %v489_v9 = vpop.permute.xlu1 %488  ;;  %v484_v10 = vpop.permute.xlu0 %483 }
  0xab   :  { %v499_v11 = vpop.permute.xlu1 %498  ;;  %v494_v12 = vpop.permute.xlu0 %493 }
  0xaf   :  { %v509_v13 = vpop.permute.xlu1 %508  ;;  %v504_v14 = vpop.permute.xlu0 %503 }
  0xb3   :  { %v519_v15 = vpop.permute.xlu1 %518  ;;  %v514_v16 = vpop.permute.xlu0 %513 }
  0xb7   :  { %v1302_v17 = vpop.permute.xlu1 %528  ;;  %v1304_v18 = vpop.permute.xlu0 %523 }
  0xbb   :  { %v539_v39 = vpop.permute.xlu1 %538  ;;  %v534_v40 = vpop.permute.xlu0 %533 }
  0xf5   :  { %v994_v19 = vpop.f32.mrb[0].mxu0  ;;  %v1010_v20 = vpop.f32.mrb[0].mxu1 }
  0xf6   :  { %v242_v21 = vpop.f32.mrb[1].mxu0  ;;  %v306_v22 = vpop.f32.mrb[1].mxu1  ;;  %v563_v25 = vmul.f32 %v994_v19, %v414_v57  ;;  %v579_v26 = vmul.f32 %v1010_v20, %v494_v12 }
  0xf7   :  { %v995_v23 = vpop.f32.mrb[2].mxu0  ;;  %v1011_v24 = vpop.f32.mrb[2].mxu1  ;;  %v561_v31 = vmul.f32 %v404_v58, %v242_v21  ;;  %v577_v32 = vmul.f32 %v484_v10, %v306_v22 }
  0xf8   :  { %v564_v27 = vmul.f32 %v995_v23, %v419_v59  ;;  %v580_v28 = vmul.f32 %v1011_v24, %v499_v11  ;;  %v245_v29 = vpop.f32.mrb[3].mxu0  ;;  %v309_v30 = vpop.f32.mrb[3].mxu1 }
  0xf9   :  { %v562_v33 = vmul.f32 %v409_v60, %v245_v29  ;;  %v578_v34 = vmul.f32 %v489_v9, %v309_v30  ;;  %v549_v9 = vpop.permute.xlu1 %548  ;;  %v544_v10 = vpop.permute.xlu0 %543 }
  0xfa   :  { %v865_v35 = vpack.c.bf16 %v564_v27, %v563_v25  ;;  %v905_v36 = vpack.c.bf16 %v580_v28, %v579_v26 }
  0xfb   :  { %v860_v37 = vpack.c.bf16 %v562_v33, %v561_v31  ;;  %v900_v38 = vpack.c.bf16 %v578_v34, %v577_v32 }
  0xfc   :  { %937 = vst [vmem:[#allocation2 + $0x8] sm:$0xff] %v865_v35   ;;  %945 = vst [vmem:[#allocation2 + $0x48] sm:$0xff] %v905_v36  }
  0xfd   :  { %861 = vst [vmem:[#allocation2] sm:$0xff] %v860_v37   ;;  %944 = vst [vmem:[#allocation2 + $0x40] sm:$0xff] %v900_v38   ;;  %v998_v41 = vpop.f32.mrb[4].mxu0  ;;  %v1014_v42 = vpop.f32.mrb[4].mxu1 }
  0xfe   :  { %v258_v43 = vpop.f32.mrb[5].mxu0  ;;  %v322_v44 = vpop.f32.mrb[5].mxu1  ;;  %v567_v47 = vmul.f32 %v998_v41, %v434_v0  ;;  %v583_v48 = vmul.f32 %v1014_v42, %v514_v16 }
  0xff   :  { %v999_v45 = vpop.f32.mrb[6].mxu0  ;;  %v1015_v46 = vpop.f32.mrb[6].mxu1  ;;  %v565_v53 = vmul.f32 %v424_v62, %v258_v43  ;;  %v581_v54 = vmul.f32 %v504_v14, %v322_v44 }
 0x100   :  { %v568_v49 = vmul.f32 %v999_v45, %v439_v63  ;;  %v584_v50 = vmul.f32 %v1015_v46, %v519_v15  ;;  %v261_v51 = vpop.f32.mrb[7].mxu0  ;;  %v325_v52 = vpop.f32.mrb[7].mxu1 }
 0x101   :  { %v566_v55 = vmul.f32 %v429_v61, %v261_v51  ;;  %v582_v56 = vmul.f32 %v509_v13, %v325_v52  ;;  %v559_v29 = vpop.permute.xlu1 %558 }
 0x102   :  { %v875_v57 = vpack.c.bf16 %v568_v49, %v567_v47  ;;  %v915_v58 = vpack.c.bf16 %v584_v50, %v583_v48 }
 0x103   :  { %v870_v59 = vpack.c.bf16 %v566_v55, %v565_v53  ;;  %v910_v60 = vpack.c.bf16 %v582_v56, %v581_v54 }
 0x104   :  { %939 = vst [vmem:[#allocation2 + $0x18] sm:$0xff] %v875_v57   ;;  %947 = vst [vmem:[#allocation2 + $0x58] sm:$0xff] %v915_v58  }
 0x105   :  { %938 = vst [vmem:[#allocation2 + $0x10] sm:$0xff] %v870_v59   ;;  %946 = vst [vmem:[#allocation2 + $0x50] sm:$0xff] %v910_v60   ;;  %v1002_v0 = vpop.f32.mrb[8].mxu0  ;;  %v1018_v11 = vpop.f32.mrb[8].mxu1 }
 0x106   :  { %v274_v63 = vpop.f32.mrb[9].mxu0  ;;  %v338_v12 = vpop.f32.mrb[9].mxu1  ;;  %v571_v62 = vmul.f32 %v1002_v0, %v1292_v4  ;;  %v587_v61 = vmul.f32 %v1018_v11, %v534_v40 }
 0x107   :  { %v1003_v15 = vpop.f32.mrb[10].mxu0  ;;  %v1019_v16 = vpop.f32.mrb[10].mxu1  ;;  %v569_v21 = vmul.f32 %v1288_v2, %v274_v63  ;;  %v585_v22 = vmul.f32 %v1304_v18, %v338_v12 }
 0x108   :  { %v572_v13 = vmul.f32 %v1003_v15, %v1290_v3  ;;  %v588_v14 = vmul.f32 %v1019_v16, %v539_v39  ;;  %v277_v19 = vpop.f32.mrb[11].mxu0  ;;  %v341_v20 = vpop.f32.mrb[11].mxu1 }
 0x109   :  { %v570_v23 = vmul.f32 %v1286_v1, %v277_v19  ;;  %v586_v24 = vmul.f32 %v1302_v17, %v341_v20  ;;  %v554_v4 = vpop.permute.xlu0 %553 }
 0x10a   :  { %v885_v25 = vpack.c.bf16 %v572_v13, %v571_v62  ;;  %v925_v26 = vpack.c.bf16 %v588_v14, %v587_v61 }
 0x10b   :  { %v880_v27 = vpack.c.bf16 %v570_v23, %v569_v21  ;;  %v920_v28 = vpack.c.bf16 %v586_v24, %v585_v22 }
 0x10c   :  { %941 = vst [vmem:[#allocation2 + $0x28] sm:$0xff] %v885_v25   ;;  %949 = vst [vmem:[#allocation2 + $0x68] sm:$0xff] %v925_v26  }
 0x10d   :  { %940 = vst [vmem:[#allocation2 + $0x20] sm:$0xff] %v880_v27   ;;  %948 = vst [vmem:[#allocation2 + $0x60] sm:$0xff] %v920_v28   ;;  %v1006_v3 = vpop.f32.mrb[12].mxu0  ;;  %v1022_v30 = vpop.f32.mrb[12].mxu1 }
 0x10e   :  { %v290_v31 = vpop.f32.mrb[13].mxu0  ;;  %v354_v2 = vpop.f32.mrb[13].mxu1  ;;  %v575_v1 = vmul.f32 %v1006_v3, %v1300_v8  ;;  %v591_v17 = vmul.f32 %v1022_v30, %v554_v4 }
 0x10f   :  { %v1007_v32 = vpop.f32.mrb[14].mxu0  ;;  %v1023_v18 = vpop.f32.mrb[14].mxu1  ;;  %v573_v37 = vmul.f32 %v1296_v6, %v290_v31  ;;  %v589_v38 = vmul.f32 %v544_v10, %v354_v2 }
 0x110   :  { %v576_v33 = vmul.f32 %v1007_v32, %v1298_v7  ;;  %v592_v34 = vmul.f32 %v1023_v18, %v559_v29  ;;  %v293_v35 = vpop.f32.mrb[15].mxu0  ;;  %v357_v36 = vpop.f32.mrb[15].mxu1 }
 0x111   :  { %v574_v39 = vmul.f32 %v1294_v5, %v293_v35  ;;  %v590_v40 = vmul.f32 %v549_v9, %v357_v36 }
 0x112   :  { %v895_v41 = vpack.c.bf16 %v576_v33, %v575_v1  ;;  %v935_v42 = vpack.c.bf16 %v592_v34, %v591_v17 }
 0x113   :  { %v890_v43 = vpack.c.bf16 %v574_v39, %v573_v37  ;;  %v930_v44 = vpack.c.bf16 %v590_v40, %v589_v38 }
 0x114   :  { %943 = vst [vmem:[#allocation2 + $0x38] sm:$0xff] %v895_v41   ;;  %951 = vst [vmem:[#allocation2 + $0x78] sm:$0xff] %v935_v42  }
 0x115   :  { %942 = vst [vmem:[#allocation2 + $0x30] sm:$0xff] %v890_v43   ;;  %950 = vst [vmem:[#allocation2 + $0x70] sm:$0xff] %v930_v44  }
 0x116   :  { %1081 = shalt.err (!%p1078_p4)
}
 0x117   :  { %s1082_s16 = scalar_lea.hbm %s1331_s3, 2048 }
 0x118   :  { %p1083_p5 = scmp.ne.s32.totalorder %s1331_s3, %s1082_s16  ;;  %p1086_p6 = scmp.lt.u32.totalorder %s1082_s16, %s1331_s3 }
 0x11a   :  { %p1088_p7 = pnand %p1086_p6, %p1083_p5 }
 0x11c   :  { %1091 = shalt.err (!%p1088_p7)
}
 0x11d   :  { %s1096_s21 = smov 64   ;;  %s1097_s22 = smov 4  }
 0x11e   :  { %764 = dma.vmem_to_hbm [thread:$0]  %s759_s12, 2048, %s1331_s3, [#allocation3], %s1096_s21, %s1096_s21, %s1097_s22  }
 0x11f   :  { %1092 = dma.done.wait [#allocation3], 2048  }
 0x120   :  { %1093 = vsyncadd [#allocation3], 4294965248 }
 0x121   :  { %768 = vsyncpa [#allocation3], 1 }

</bundles_post_ra>
